<compile_context>
chip_gen: v5e
topology: v5e:2x2
jax: 0.10.0
libtpu: 0.0.40
codegen_flags: <defaults>
</compile_context>

<pallas_src>
import functools

import jax
import jax.numpy as jnp
from jax.experimental import pallas as pl
from jax.experimental.pallas import tpu as pltpu


_TARGET_BLOCK_BYTES = 2 * 1024 * 1024   # per-input VMEM block (Pallas double-buffers)


def _cwbce_kernel(w_ref, s_ref, g_ref, out_ref, *, num_classes):
    """grid = (batch, spatial_tiles); out_ref is a (1, 8, lane) partial sum."""
    b = pl.program_id(0)                          # batch row index

    s = s_ref[0].astype(jnp.float32)              # (t_sub, lane)
    g = g_ref[0].astype(jnp.float32)              # (t_sub, lane)

    # Numerically-stable BCE-with-logits, elementwise ('none' reduction).
    l = jnp.maximum(s, 0.0) - s * g + jnp.log1p(jnp.exp(-jnp.abs(s)))

    def _write(val):
        # Collapse the sublane axis in groups of 8: tile-aligned reshape, pure
        # vreg adds (hidden under the HBM-bound DMA).  Cross-lane reduce and the
        # mean happen in plain JAX outside the kernel.
        out_ref[...] = val.reshape(-1, 8, val.shape[-1]).sum(axis=0)[None]

    # Only the first K batch rows get per-element class weights (uniform scf.if
    # on the batch grid scalar -> unweighted rows skip the weight math).
    @pl.when(b < num_classes)
    def _():
        if num_classes == 2:
            # Binary case: arithmetic lookup, no compares / select chain.
            w0 = w_ref[0]
            w1 = w_ref[1]
            w = w0 + (w1 - w0) * g
        else:
            # Targets are (float-valued) class indices -> float select chain.
            w = jnp.full_like(l, w_ref[0])
            for c in range(1, num_classes):
                w = jnp.where(g == jnp.float32(c), w_ref[c], w)
        _write(l * w)

    @pl.when(b >= num_classes)
    def _():
        _write(l)


def _choose_tiling(N, itemsize):
    """Pick (lane, t_sub, num_tiles, n_pad) for the flattened feature axis.

    Prefers a tiling needing NO tail padding (padding costs a full HBM copy of
    both inputs — the largest avoidable overhead for this mem-bound kernel).
    """
    for lane in (512, 256, 128):
        if N % (8 * lane):
            continue
        sub_budget = max(8, (_TARGET_BLOCK_BYTES // (itemsize * lane)) // 8 * 8)
        R = N // lane                                  # multiple of 8
        if R <= sub_budget:
            return lane, R, 1, N                       # one block per row, no pad
        m = R // 8
        t_sub = 8
        for d in range(min(m, sub_budget // 8), 0, -1):
            if m % d == 0:
                t_sub = 8 * d
                break
        # Accept only if blocks stay big enough to amortise per-step overhead.
        if t_sub * lane * itemsize >= _TARGET_BLOCK_BYTES // 8:
            return lane, t_sub, R // t_sub, N
    # Fallback: widest lanes + tail padding (padded terms are exact zeros).
    lane = 512
    sub_budget = max(8, (_TARGET_BLOCK_BYTES // (itemsize * lane)) // 8 * 8)
    block_elems = sub_budget * lane
    if N <= block_elems:
        n_pad = pl.cdiv(N, 8 * lane) * (8 * lane)
        return lane, n_pad // lane, 1, n_pad
    n_pad = pl.cdiv(N, block_elems) * block_elems
    return lane, sub_budget, n_pad // block_elems, n_pad


def class_weighted_bce_with_logits(s, g, class_weights):
    """s, g: (B, C, H, W); class_weights: (K,). Returns scalar loss (f32)."""
    B, C, H, W = s.shape
    N = C * H * W
    K = int(class_weights.shape[0])

    # Ship inputs in their native (possibly narrow) dtype — kernel is HBM-bound.
    itemsize = max(jnp.dtype(s.dtype).itemsize, jnp.dtype(g.dtype).itemsize)

    lane, t_sub, num_tiles, n_pad = _choose_tiling(N, itemsize)

    s2 = s.reshape(B, N)
    g2 = g.reshape(B, N)
    pad = n_pad - N
    if pad:
        # (logit=1000, target=1) -> BCE term is exactly 0 in f32 (and 0*w == 0),
        # so no in-kernel mask; mean divides by the true element count.
        s2 = jnp.pad(s2, ((0, 0), (0, pad)), constant_values=1000.0)
        g2 = jnp.pad(g2, ((0, 0), (0, pad)), constant_values=1.0)

    R = n_pad // lane
    s3 = s2.reshape(B, R, lane)        # contiguous reshape (free when pad == 0)
    g3 = g2.reshape(B, R, lane)

    kernel = functools.partial(_cwbce_kernel, num_classes=K)

    partials = pl.pallas_call(
        kernel,
        out_shape=jax.ShapeDtypeStruct((B, num_tiles * 8, lane), jnp.float32),
        grid=(B, num_tiles),
        in_specs=[
            pl.BlockSpec(memory_space=pltpu.MemorySpace.SMEM),          # class weights
            pl.BlockSpec((1, t_sub, lane), lambda b, t: (b, t, 0)),     # logits tile
            pl.BlockSpec((1, t_sub, lane), lambda b, t: (b, t, 0)),     # targets tile
        ],
        out_specs=pl.BlockSpec((1, 8, lane), lambda b, t: (b, t, 0)),   # lane-dense partials
        compiler_params=pltpu.CompilerParams(
            dimension_semantics=("parallel", "parallel"),
        ),
    )(class_weights.astype(jnp.float32), s3, g3)

    # Final reduce + mean over the TRUE element count (padding contributed 0).
    return jnp.sum(partials) / jnp.float32(B * N)


def _reference(s, g, class_weights):
    """Pure-JAX reference mirroring the PyTorch forward exactly (f32 math)."""
    s = s.astype(jnp.float32)
    g = g.astype(jnp.float32)
    l = jnp.maximum(s, 0.0) - s * g + jnp.log1p(jnp.exp(-jnp.abs(s)))
    K = class_weights.shape[0]
    w = class_weights[g[:K].astype(jnp.int32)]
    l = l.at[:K].set(l[:K] * w)
    return l.mean()


if __name__ == "__main__":
    key = jax.random.PRNGKey(0)
    k1, k2, k3, k4 = jax.random.split(key, 4)

    # --- Test 1: binary targets, K=2 (no-pad tiling, arithmetic weight path) ---
    B, C, H, W = 3, 4, 16, 16
    logits = jax.random.normal(k1, (B, C, H, W), dtype=jnp.float32).astype(jnp.bfloat16)
    targets = jax.random.bernoulli(k2, p=0.5, shape=(B, C, H, W)).astype(jnp.bfloat16)
    class_weights = jnp.array([0.3, 0.7], dtype=jnp.float32)

    loss = jax.block_until_ready(
        class_weighted_bce_with_logits(logits, targets, class_weights))
    ref = jax.block_until_ready(_reference(logits, targets, class_weights))
    assert jnp.allclose(loss, ref, rtol=2e-5, atol=1e-6), (loss, ref)

    # --- Test 2: K=3 (padded fallback tiling + general select-chain weights) ---
    B2, C2, H2, W2 = 3, 4, 8, 16
    logits2 = jax.random.normal(k3, (B2, C2, H2, W2), dtype=jnp.float32).astype(jnp.bfloat16)
    targets2 = jax.random.randint(k4, (B2, C2, H2, W2), 0, 3).astype(jnp.bfloat16)
    class_weights2 = jnp.array([0.2, 0.3, 0.5], dtype=jnp.float32)

    loss2 = jax.block_until_ready(
        class_weighted_bce_with_logits(logits2, targets2, class_weights2))
    ref2 = jax.block_until_ready(_reference(logits2, targets2, class_weights2))
    assert jnp.allclose(loss2, ref2, rtol=2e-5, atol=1e-6), (loss2, ref2)

    print("KERNEL_OK")
</pallas_src>

<mosaic_0001>
module attributes {stable_mosaic.version = 11 : i64} {
  func.func @_cwbce_kernel(%arg0: i32, %arg1: i32, %arg2: memref<2xf32, #tpu.memory_space<smem>>, %arg3: memref<1x8x128xbf16, #tpu.memory_space<vmem>>, %arg4: memref<1x8x128xbf16, #tpu.memory_space<vmem>>, %arg5: memref<1x8x128xf32, #tpu.memory_space<vmem>>) attributes {dimension_semantics = [#tpu.dimension_semantics<parallel>, #tpu.dimension_semantics<parallel>], iteration_bounds = array<i64: 3, 1>, scalar_prefetch = 0 : i64, scratch_operands = 0 : i64, tpu.core_type = #tpu.core_type<tc>, window_params = [{transform_indices = @transform_0, window_bounds = array<i64: 2>}, {transform_indices = @transform_1, window_bounds = array<i64: 1, 8, 128>}, {transform_indices = @transform_2, window_bounds = array<i64: 1, 8, 128>}, {transform_indices = @transform_3, window_bounds = array<i64: 1, 8, 128>}]} {
    %c0 = arith.constant 0 : index
    %c0_0 = arith.constant 0 : index
    %c0_1 = arith.constant 0 : index
    %0 = vector.load %arg3[%c0, %c0_0, %c0_1] : memref<1x8x128xbf16, #tpu.memory_space<vmem>>, vector<1x8x128xbf16>
    %1 = vector.shape_cast %0 : vector<1x8x128xbf16> to vector<8x128xbf16>
    %2 = arith.extf %1 : vector<8x128xbf16> to vector<8x128xf32>
    %c0_2 = arith.constant 0 : index
    %c0_3 = arith.constant 0 : index
    %c0_4 = arith.constant 0 : index
    %3 = vector.load %arg4[%c0_2, %c0_3, %c0_4] : memref<1x8x128xbf16, #tpu.memory_space<vmem>>, vector<1x8x128xbf16>
    %4 = vector.shape_cast %3 : vector<1x8x128xbf16> to vector<8x128xbf16>
    %5 = arith.extf %4 : vector<8x128xbf16> to vector<8x128xf32>
    %cst = arith.constant 0.000000e+00 : f32
    %6 = vector.broadcast %cst : f32 to vector<8x128xf32>
    %7 = arith.maximumf %2, %6 : vector<8x128xf32>
    %8 = arith.mulf %2, %5 : vector<8x128xf32>
    %9 = arith.subf %7, %8 : vector<8x128xf32>
    %10 = math.absf %2 : vector<8x128xf32>
    %cst_5 = arith.constant 0.000000e+00 : f32
    %11 = vector.broadcast %cst_5 : f32 to vector<8x128xf32>
    %12 = arith.subf %11, %10 : vector<8x128xf32>
    %13 = math.exp %12 : vector<8x128xf32>
    %14 = math.log1p %13 : vector<8x128xf32>
    %15 = arith.addf %9, %14 : vector<8x128xf32>
    %c2_i32 = arith.constant 2 : i32
    %16 = arith.cmpi slt, %arg0, %c2_i32 : i32
    %17 = arith.extui %16 : i1 to i32
    %c0_i32 = arith.constant 0 : i32
    %18 = arith.cmpi ne, %17, %c0_i32 : i32
    scf.if %18 {
      %c0_8 = arith.constant 0 : index
      %22 = memref.load %arg2[%c0_8] : memref<2xf32, #tpu.memory_space<smem>>
      %c1 = arith.constant 1 : index
      %23 = memref.load %arg2[%c1] : memref<2xf32, #tpu.memory_space<smem>>
      %24 = arith.subf %23, %22 : f32
      %25 = vector.broadcast %24 : f32 to vector<8x128xf32>
      %26 = arith.mulf %25, %5 : vector<8x128xf32>
      %27 = vector.broadcast %22 : f32 to vector<8x128xf32>
      %28 = arith.addf %27, %26 : vector<8x128xf32>
      %29 = arith.mulf %15, %28 : vector<8x128xf32>
      %30 = vector.shape_cast %29 : vector<8x128xf32> to vector<1x8x128xf32>
      %cst_9 = arith.constant dense<0.000000e+00> : vector<8x128xf32>
      %31 = vector.multi_reduction <add>, %30, %cst_9 [0] : vector<1x8x128xf32> to vector<8x128xf32>
      %32 = vector.shape_cast %31 : vector<8x128xf32> to vector<1x8x128xf32>
      %c0_10 = arith.constant 0 : index
      %c0_11 = arith.constant 0 : index
      %c0_12 = arith.constant 0 : index
      %33 = vector.load %arg5[%c0_10, %c0_11, %c0_12] : memref<1x8x128xf32, #tpu.memory_space<vmem>>, vector<1x8x128xf32>
      tpu.vector_store %arg5[%c0_10, %c0_11, %c0_12], %32 {strides = array<i32>} : memref<1x8x128xf32, #tpu.memory_space<vmem>>, vector<1x8x128xf32>,
    } else {
    }
    %c2_i32_6 = arith.constant 2 : i32
    %19 = arith.cmpi sge, %arg0, %c2_i32_6 : i32
    %20 = arith.extui %19 : i1 to i32
    %c0_i32_7 = arith.constant 0 : i32
    %21 = arith.cmpi ne, %20, %c0_i32_7 : i32
    scf.if %21 {
      %22 = vector.shape_cast %15 : vector<8x128xf32> to vector<1x8x128xf32>
      %cst_8 = arith.constant dense<0.000000e+00> : vector<8x128xf32>
      %23 = vector.multi_reduction <add>, %22, %cst_8 [0] : vector<1x8x128xf32> to vector<8x128xf32>
      %24 = vector.shape_cast %23 : vector<8x128xf32> to vector<1x8x128xf32>
      %c0_9 = arith.constant 0 : index
      %c0_10 = arith.constant 0 : index
      %c0_11 = arith.constant 0 : index
      %25 = vector.load %arg5[%c0_9, %c0_10, %c0_11] : memref<1x8x128xf32, #tpu.memory_space<vmem>>, vector<1x8x128xf32>
      tpu.vector_store %arg5[%c0_9, %c0_10, %c0_11], %24 {strides = array<i32>} : memref<1x8x128xf32, #tpu.memory_space<vmem>>, vector<1x8x128xf32>,
    } else {
    }
    return
  }
  func.func @transform_0(%arg0: i32, %arg1: i32) -> i32 {
    %c0_i32 = arith.constant 0 : i32
    %c0_i32_0 = arith.constant 0 : i32
    return %c0_i32 : i32
  }
  func.func @transform_1(%arg0: i32, %arg1: i32) -> (i32, i32, i32) {
    %c0_i32 = arith.constant 0 : i32
    %c0_i32_0 = arith.constant 0 : i32
    return %arg0, %arg1, %c0_i32 : i32, i32, i32
  }
  func.func @transform_2(%arg0: i32, %arg1: i32) -> (i32, i32, i32) {
    %c0_i32 = arith.constant 0 : i32
    %c0_i32_0 = arith.constant 0 : i32
    return %arg0, %arg1, %c0_i32 : i32, i32, i32
  }
  func.func @transform_3(%arg0: i32, %arg1: i32) -> (i32, i32, i32) {
    %c0_i32 = arith.constant 0 : i32
    %c0_i32_0 = arith.constant 0 : i32
    return %arg0, %arg1, %c0_i32 : i32, i32, i32
  }
}

</mosaic_0001>

<bundles_post_ra>
// kernel: tpu_custom_call.1
= control target key start
LH: loop header
LB: loop body
LE: loop exit
PB: predicated region body
PF: predicated region fallthrough
CT: control target
= control target key end

     0   :  { %s880_s0 = inlined_call_operand.hbm [shape: f32[2], index: 0, kind: input, shape index: {}]   ;;  %s881_s1 = inlined_call_operand.hbm [shape: bf16[3,8,128], index: 1, kind: input, shape index: {}]   ;;  %s882_s2 = inlined_call_operand.hbm [shape: bf16[3,8,128], index: 2, kind: input, shape index: {}]   ;;  %s883_s3 = inlined_call_operand.hbm [shape: f32[3,8,128], index: 3, kind: output, shape index: {}]  }
   0x1   :  { %885 = sst [smem:[#allocation15_spill]] %s880_s0 }
   0x2   :  { %8 = vsyncpa [#allocation5], 0 }
   0x3   :  { %9 = vsyncpa [#allocation3], 0 }
   0x4   :  { %11 = vsyncpa [#allocation3 + $0x1], 0 }
   0x5   :  { %12 = vsyncpa [#allocation8], 0 }
   0x6   :  { %14 = vsyncpa [#allocation8 + $0x1], 0 }
   0x7   :  { %15 = vsyncpa [#allocation4], 0 }
   0x8   :  { %17 = vsyncpa [#allocation4 + $0x1], 0  ;;  %s726_s12 = smov 0   ;;  %s728_s13 = smov 0  }
   0x9   :  { %s730_s14 = smov 0   ;;  %s732_s15 = smov 0  }
   0xa   :  { %s734_s16 = smov 0   ;;  %s736_s17 = smov 0  }
   0xb LB: > { %s435_s18 = sadd.s32 4294967295, %s703_s17   ;;  %s436_s19 = sadd.s32 4294967294, %s703_s17   ;;  %s703_s17 = sphi %s736_s17, %s23_s17   ;;  %s699_s16 = sphi %s734_s16, %s899_s16   ;;  %s695_s15 = sphi %s732_s15, %s898_s15   ;;  %s691_s14 = sphi %s730_s14, %s897_s14   ;;  %s687_s13 = sphi %s728_s13, %s896_s13   ;;  %s683_s12 = sphi %s726_s12, %s895_s12  }
   0xc   : > { %p78_p0 = scmp.ne.s32.totalorder %s687_s13, %s683_s12  ;;  %p760_p1 = scmp.eq.s32.totalorder %s435_s18, 0 }
   0xd   : > { %p764_p2 = scmp.eq.s32.totalorder %s435_s18, 2  ;;  %p138_p3 = scmp.eq.s32.totalorder %s436_s19, 2 }
   0xe   : > { %p770_p4 = por %p760_p1, %p78_p0  ;;  %p437_p5 = scmp.ge.s32.totalorder %s703_s17, 1 }
   0xf   : > { %p775_p6 = por %p138_p3, %p78_p0  ;;  %p145_p7 = scmp.lt.s32.totalorder %s703_s17, 4 }
  0x10   : > { %s890_s0 = sld [smem:[#allocation15_spill]]  ;;  %s35_s28 = sadd.s32 1, %s699_s16 }
  0x11   : > { %p783_p8 = pnand %p437_p5, %p145_p7  ;;  %s65_s29 = sadd.s32 1, %s691_s14 }
  0x12   : > { %p37_p11 = scmp.ge.s32.totalorder %s35_s28, 3  ;;  %s705_s30 = smov [#allocation2]  }
  0x13   : > { %p466_p9 = pneg %p783_p8  ;;  %p72_p12 = scmp.ne.s32.totalorder %s691_s14, %s687_s13 }
  0x14   : > { %s901_s28 = smov (%p37_p11, %s35_s28), 0  ;;  %p73_p13 = scmp.eq.s32.totalorder %s703_s17, 0 }
  0x15   : > { %p467_p10 = pnand %p466_p9, %p760_p1  ;;  %892 = sst [smem:[#allocation14_spill]] %s901_s28 }
  0x16   : > { %s157_s26 = sshll.u32 %s890_s0, 4  ;;  %s60_s4 = ssub.s32 %s699_s16, %s901_s28  ;;  %s158_s26 = int_to_ptr.hbm [resolvable:$true] %s157_s26 }
  0x17   : > { %469 = dma.hbm_to_smem (!%p467_p10), %s158_s26, 16, %s705_s30, [#allocation5]  }
  0x18   : > { %p482_p0 = scmp.lt.s32.totalorder %s703_s17, 3  ;;  %p63_p3 = scmp.eq.s32.totalorder %s60_s4, 0 }
  0x19   : > { %p74_p5 = por %p73_p13, %p72_p12  ;;  %p803_p7 = por %p764_p2, %p72_p12 }
  0x1a   : > { %s168_s6 = sand.u32 1, %s691_s14   ;;  %s441_s9 = sshll.u32 %s699_s16, 2 }
  0x1b   : > { %s809_s7 = scalar_select %p63_p3, %s691_s14, %s65_s29  }
  0x1c   : > { %s440_s8 = sshll.u32 %s168_s6, 2  ;;  %s177_s18 = scalar_lea.hbm %s881_s1, %s441_s9 }
  0x1d   : > { %s172_s19 = scalar_lea.vmem [#allocation6], %s440_s8  ;;  %s179_s25 = sshll.u32 %s177_s18, 4  ;;  %s180_s25 = int_to_ptr.hbm [resolvable:$true] %s179_s25 }
  0x1e   : > { %s181_s24 = sshll.u32 %s172_s19, 4  ;;  %p471_p9 = pnand %p482_p0, %p74_p5  ;;  %s182_s24 = int_to_ptr.vmem [resolvable:$true] %s181_s24 }
  0x1f   : > { %s197_s30 = scalar_lea.hbm %s882_s2, %s441_s9  ;;  %s169_s4 = scalar_lea.sflag [#allocation3], %s168_s6 }
  0x20   : > { %473 = dma.hbm_to_vmem [thread:$0]  (!%p471_p9), %s180_s25, 64, %s182_s24, %s169_s4  }
  0x21   : > { %s199_s29 = sshll.u32 %s197_s30, 4  ;;  %s192_s0 = scalar_lea.vmem [#allocation7], %s440_s8  ;;  %s200_s29 = int_to_ptr.hbm [resolvable:$true] %s199_s29 }
  0x22   : > { %s201_s28 = sshll.u32 %s192_s0, 4  ;;  %s189_s10 = scalar_lea.sflag [#allocation8], %s168_s6  ;;  %s202_s28 = int_to_ptr.vmem [resolvable:$true] %s201_s28 }
  0x23   : > { %476 = dma.hbm_to_vmem [thread:$0]  (!%p471_p9), %s200_s29, 64, %s202_s28, %s189_s10  }
  0x24   : > { %210 = sbr.rel (%p783_p8) target bundleno = 110 (0x6e), region = 32 }
  0x29   : > { %666 = dma.done.wait (%p760_p1), [#allocation5], 16  }
  0x2a   : > { %668 = vsyncadd (%p760_p1), [#allocation5], 4294967280  ;;  %s827_s9 = sand.u32 1, %s687_s13  }
  0x2b   : > { %s446_s0 = sshll.u32 %s827_s9, 2  ;;  %s218_s8 = scalar_lea.sflag [#allocation3], %s827_s9 }
  0x2c   : > { %s221_s11 = scalar_lea.vmem [#allocation6], %s446_s0 }
  0x2d   : > { %670 = dma.done.wait (%p770_p4), %s218_s8, 64  }
  0x2e   : > { %672 = vsyncadd (%p770_p4), %s218_s8, 4294967232  ;;  %s228_s27 = scalar_lea.sflag [#allocation8], %s827_s9  ;;  %s231_s28 = scalar_lea.vmem [#allocation7], %s446_s0 }
  0x2f   : > { %674 = dma.done.wait (%p770_p4), %s228_s27, 64  }
  0x30   : > { %676 = vsyncadd (%p770_p4), %s228_s27, 4294967232 }
  0x31   : > { %237 = sfence }
  0x32   : > { %s448_s20 = sshll.u32 %s827_s9, 3  ;;  %v261_v0 = vld [vmem:[%s221_s11] sm:$0xf]  ;;  %v263_v5 = vld [vmem:[%s231_s28] sm:$0xf]  ;;  %p449_p1 = scmp.ge.s32.totalorder %s695_s15, 2 }
  0x33   : > { %v262_v1 = vunpack.c.l.bf16 %v261_v0  ;;  %v264_v7 = vunpack.c.l.bf16 %v263_v5  ;;  %s260_s22 = scalar_lea.vmem [#allocation9], %s448_s20  ;;  %s286_s6 = sld [smem:[#allocation2]] (!%p449_p1) }
  0x34   : > { %s450_s18 = sld [smem:[#allocation2 + $0x1]] (!%p449_p1) }
  0x35   : > { %v268_v2 = vand.u32 2147483647, %v262_v1  ;;  %v265_v11 = vmax.f32 %v262_v1, 0.0  ;;  %v266_v12 = vmul.f32 %v264_v7, %v262_v1 }
  0x37   : > { %v269_v3 = vsub.f32 0.0, %v268_v2  ;;  %v267_v16 = vsub.f32 %v265_v11, %v266_v12 }
  0x39   : > { %v270_v4 = vmul.f32 1.442695, %v269_v3 }
  0x3a   : > { %s288_s19 = ssub.f32 (!%p449_p1), %s450_s18, %s286_s6 }
  0x3b   : > { %534 = vpow2.f32 %v270_v4 }
  0x41   : > { %v535_v6 = vpop.eup %534 }
  0x42   : > { %v272_v8 = vadd.f32 1.0, %v535_v6  ;;  %v275_v9 = vmul.f32 -0.5, %v535_v6  ;;  %v278_v13 = vand.u32 2147483647, %v535_v6 }
  0x44   : > { %536 = vlog2.f32 %v272_v8  ;;  %v276_v10 = vadd.f32 1.0, %v275_v9  ;;  %vm279_vm0 = vcmp.lt.f32.partialorder %v278_v13, 0.0004427343 }
  0x46   : > { %v277_v14 = vmul.f32 %v535_v6, %v276_v10 }
  0x4a   : > { %v537_v15 = vpop.eup %536  ;;  %285 = sbr.rel (%p449_p1) target bundleno = 87 (0x57), region = 48 }
  0x4b   : > { %v274_v17 = vmul.f32 0.6931472, %v537_v15 }
  0x4d   : > { %v280_v18 = vsel %vm279_vm0, %v277_v14, %v274_v17 }
  0x4e   : > { %v281_v19 = vadd.f32 %v280_v18, %v267_v16 }
  0x4f   : > { %v289_v20 = vstv %s288_s19  ;;  %v291_v21 = vstv %s286_s6 }
  0x50   : > { %v290_v22 = vmul.f32 %v289_v20, %v264_v7 }
  0x52   : > { %v292_v23 = vadd.f32 %v291_v21, %v290_v22 }
  0x54   : > { %v293_v24 = vmul.f32 %v292_v23, %v281_v19 }
  0x56   : > { %295 = vst [vmem:[%s260_s22] sm:$0xff] %v293_v24 }
  0x57 PF: > { %p451_p2 = scmp.lt.s32.totalorder %s695_s15, 2 }
  0x59   : > { %299 = sbr.rel (%p451_p2) target bundleno = 95 (0x5f), region = 52 }
  0x5e   : > { %301 = vst [vmem:[%s260_s22] sm:$0xff] %v281_v19 }
  0x5f PF: > { %s453_s24 = sshll.u32 %s695_s15, 3  ;;  %s316_s30 = sshll.u32 %s260_s22, 4  ;;  %s317_s30 = int_to_ptr.vmem [resolvable:$true] %s316_s30 }
  0x60   : > { %s314_s26 = scalar_lea.hbm %s883_s3, %s453_s24  ;;  %s303_s29 = scalar_lea.sflag [#allocation4], %s827_s9 }
  0x61   : > { %s318_s4 = sshll.u32 %s314_s26, 4  ;;  %s633_s15 = scalar_lea.hbm %s883_s3, 24  ;;  %s319_s4 = int_to_ptr.hbm [resolvable:$true] %s318_s4 }
  0x62   : > { %s627_s10 = sshra.s32 %s319_s4, 4  ;;  %s628_s10 = int_to_ptr.hbm [resolvable:$true] %s627_s10 }
  0x63   : > { %s629_s0 = scalar_lea.hbm %s628_s10, 8  ;;  %p634_p11 = scmp.lt.s32.totalorder %s628_s10, %s883_s3 }
  0x64   : > { %p630_p4 = scmp.ne.s32.totalorder %s628_s10, %s629_s0  ;;  %p635_p12 = scmp.lt.s32.totalorder %s633_s15, %s629_s0 }
  0x66   : > { %p631_p8 = pnand %p630_p4, %p803_p7  ;;  %p636_p13 = por %p635_p12, %p634_p11 }
  0x68   : > { %p632_p10 = pneg %p631_p8 }
  0x6a   : > { %p637_p0 = pnand %p636_p13, %p632_p10 }
  0x6c   : > { %640 = shalt.err (!%p637_p0)
}
  0x6d   : > { %464 = dma.vmem_to_hbm [thread:$0]  (%p803_p7), %s317_s30, 128, %s319_s4, %s303_s29  }
  0x6e PF: > { %p484_p3 = scmp.ge.s32.totalorder %s703_s17, 2  ;;  %s330_s9 = sand.u32 1, %s683_s12  }
  0x6f   : > { %s331_s20 = scalar_lea.sflag [#allocation4], %s330_s9 }
  0x70   : > { %p478_p5 = pnand %p484_p3, %p775_p6 }
  0x72   : > { %p479_p9 = pneg %p478_p5 }
  0x74   : > { %678 = dma.done.wait (%p479_p9), %s331_s20, 128  }
  0x75   : > { %680 = vsyncadd (%p479_p9), %s331_s20, 4294967168  ;;  %s23_s17 = sadd.s32 1, %s703_s17   ;;  %s894_s5 = sld [smem:[#allocation14_spill]] }
  0x76   : > { %p20_p1 = scmp.ge.s32.totalorder %s23_s17, 5   ;;  %s895_s12 = smov %s687_s13 }
  0x77   : > { %s896_s13 = smov %s691_s14  ;;  %s897_s14 = smov %s809_s7 }
  0x78   : > { %s898_s15 = smov %s699_s16  ;;  %22 = sbr.rel (!%p20_p1) target bundleno = 11 (0xb), region = 103 }
  0x7b   : > { %s899_s16 = smov %s894_s5 }
  0x7d   :  { %337 = vsyncpa [#allocation3], 1 }
  0x7e   :  { %339 = vsyncpa [#allocation3 + $0x1], 1 }
  0x7f   :  { %340 = vsyncpa [#allocation8], 1 }
  0x80   :  { %342 = vsyncpa [#allocation8 + $0x1], 1 }
  0x81   :  { %343 = vsyncpa [#allocation4], 1 }
  0x82   :  { %345 = vsyncpa [#allocation4 + $0x1], 1 }
  0x83   :  { %346 = vsyncpa [#allocation5], 1 }
  0x84   :  { %348 = vsyncpa [#allocation5 + $0x1], 1 }

</bundles_post_ra>
